<compile_context>
chip_gen: v7x
topology: tpu7x:2x2x1
jax: 0.10.0
libtpu: 0.0.40
codegen_flags: <defaults>
</compile_context>

<pallas_src>
import functools

import jax
import jax.numpy as jnp
from jax import lax
from jax.experimental import pallas as pl
from jax.experimental.pallas import tpu as pltpu


def _lstm_recurrence_kernel(gx_ref, whh_t_ref, hs_ref, *, hidden_size, timesteps):
    """Full sequential LSTM recurrence in one kernel invocation.

    gx_ref:    (T, B, 4H) f32  precomputed x_t @ W_ih^T + (b_ih + b_hh)
    whh_t_ref: (H, 4H)    f32  recurrent weight, pre-transposed
    hs_ref:    (T, B, H)  f32  per-step hidden states (output)
    """
    H = hidden_size
    B = hs_ref.shape[1]

    # Hoist the (small) weight load out of the serial loop.
    whh_t = whh_t_ref[...]                       # (H, 4H)

    def step(t, carry):
        h, c = carry                             # (B, H), (B, H) in vregs
        # gates = gates_x[t] + h @ W_hh^T  -> (B, 4H): one MXU push per step,
        # lane-dense (4H = 128 when H = 32).
        gates = gx_ref[t] + jnp.dot(h, whh_t, preferred_element_type=jnp.float32)

        # Two full-width transcendentals on the (B, 4H) slab, then slice.
        sig = jax.nn.sigmoid(gates)
        th = jnp.tanh(gates)
        i_g = sig[:, 0 * H:1 * H]
        f_g = sig[:, 1 * H:2 * H]
        o_g = sig[:, 3 * H:4 * H]
        g_g = th[:, 2 * H:3 * H]

        c_new = f_g * c + i_g * g_g
        h_new = o_g * jnp.tanh(c_new)

        hs_ref[t] = h_new                        # VMEM store of this step's h
        return h_new, c_new

    h0 = jnp.zeros((B, H), jnp.float32)
    c0 = jnp.zeros((B, H), jnp.float32)
    # T is small & static: fully unroll so the scheduler sees the whole chain.
    lax.fori_loop(0, timesteps, step, (h0, c0), unroll=True)


def flow_lstm_forward(x, params):
    """x: (batch, T, input_size) float32 -> (batch, T, input_size) float32."""
    B, T, D = x.shape
    w_ih, w_hh, b_ih, b_hh, w_d, b_d = (
        params["w_ih"], params["w_hh"], params["b_ih"],
        params["b_hh"], params["w_d"], params["b_d"],
    )
    H = w_hh.shape[1]

    wih_t = jnp.transpose(w_ih).astype(jnp.float32)           # (D, 4H)
    whh_t = jnp.transpose(w_hh).astype(jnp.float32)           # (H, 4H)
    b = (b_ih + b_hh).astype(jnp.float32)                     # (4H,)
    wd_t = jnp.transpose(w_d).astype(jnp.float32)             # (H, D)
    bd = b_d.astype(jnp.float32)                              # (D,)

    # Hoisted input projection: one (B*T, D) x (D, 4H) GEMM, emitted directly
    # time-major so no separate transpose of x is materialized in HBM.
    gates_x = jnp.einsum("btd,dg->tbg", x.astype(jnp.float32), wih_t) + b  # (T,B,4H)

    kernel = functools.partial(_lstm_recurrence_kernel,
                               hidden_size=H, timesteps=T)

    hs = pl.pallas_call(
        kernel,
        out_shape=jax.ShapeDtypeStruct((T, B, H), jnp.float32),
        in_specs=[
            pl.BlockSpec(memory_space=pltpu.MemorySpace.VMEM),   # gates_x, resident
            pl.BlockSpec(memory_space=pltpu.MemorySpace.VMEM),   # W_hh^T, resident
        ],
        out_specs=pl.BlockSpec(memory_space=pltpu.MemorySpace.VMEM),
    )(gates_x, whh_t)

    # Hoisted dense projection: one (T*B, H) x (H, D) GEMM; the einsum folds the
    # time-major -> batch-major transpose, no extra HBM round trip.
    out = jnp.einsum("tbh,hd->btd", hs, wd_t) + bd             # (B, T, D)
    return out


def flow_lstm_reference(x, params):
    """Pure-JAX reference (same math, lax.scan over time)."""
    B, T, D = x.shape
    H = params["w_hh"].shape[1]
    wih_t = params["w_ih"].T
    whh_t = params["w_hh"].T
    b = params["b_ih"] + params["b_hh"]
    wd_t = params["w_d"].T
    bd = params["b_d"]

    def step(carry, x_t):
        h, c = carry
        gates = x_t @ wih_t + h @ whh_t + b
        i = jax.nn.sigmoid(gates[:, 0 * H:1 * H])
        f = jax.nn.sigmoid(gates[:, 1 * H:2 * H])
        g = jnp.tanh(gates[:, 2 * H:3 * H])
        o = jax.nn.sigmoid(gates[:, 3 * H:4 * H])
        c_new = f * c + i * g
        h_new = o * jnp.tanh(c_new)
        out = h_new @ wd_t + bd
        return (h_new, c_new), out

    h0 = jnp.zeros((B, H), jnp.float32)
    c0 = jnp.zeros((B, H), jnp.float32)
    _, outs = jax.lax.scan(step, (h0, c0), jnp.transpose(x, (1, 0, 2)))
    return jnp.transpose(outs, (1, 0, 2))


def init_params(key, input_size, hidden_size):
    """PyTorch-shaped params, uniform(-1/sqrt(H), 1/sqrt(H)) like torch defaults."""
    k = jax.random.split(key, 6)
    s = 1.0 / jnp.sqrt(hidden_size)
    return {
        "w_ih": jax.random.uniform(k[0], (4 * hidden_size, input_size),
                                   jnp.float32, -s, s),
        "w_hh": jax.random.uniform(k[1], (4 * hidden_size, hidden_size),
                                   jnp.float32, -s, s),
        "b_ih": jax.random.uniform(k[2], (4 * hidden_size,), jnp.float32, -s, s),
        "b_hh": jax.random.uniform(k[3], (4 * hidden_size,), jnp.float32, -s, s),
        "w_d": jax.random.uniform(k[4], (input_size, hidden_size),
                                  jnp.float32, -s, s),
        "b_d": jax.random.uniform(k[5], (input_size,), jnp.float32, -s, s),
    }


if __name__ == "__main__":
    # Small shapes consistent with the module's (batch, 19, 17) convention.
    batch, seq, input_size, hidden_size = 8, 8, 17, 32

    key = jax.random.PRNGKey(0)
    kx, kp = jax.random.split(key)
    x = jax.random.normal(kx, (batch, seq, input_size), jnp.float32)
    params = init_params(kp, input_size, hidden_size)

    fwd = jax.jit(flow_lstm_forward)
    out = fwd(x, params)
    out = jax.block_until_ready(out)

    ref = flow_lstm_reference(x, params)
    assert out.shape == (batch, seq, input_size)
    assert jnp.allclose(out, ref, atol=1e-5, rtol=1e-5), "mismatch vs reference"

    print("KERNEL_OK")
</pallas_src>

<mosaic_0001>
module attributes {stable_mosaic.version = 11 : i64} {
  func.func @_lstm_recurrence_kernel(%arg0: memref<8x8x128xf32, #tpu.memory_space<vmem>>, %arg1: memref<32x128xf32, #tpu.memory_space<vmem>>, %arg2: memref<8x8x32xf32, #tpu.memory_space<vmem>>) attributes {dimension_semantics = [], scalar_prefetch = 0 : i64, scratch_operands = 0 : i64, tpu.core_type = #tpu.core_type<tc>} {
    %c0 = arith.constant 0 : index
    %c0_0 = arith.constant 0 : index
    %0 = vector.load %arg1[%c0, %c0_0] : memref<32x128xf32, #tpu.memory_space<vmem>>, vector<32x128xf32>
    %cst = arith.constant 0.000000e+00 : f32
    %1 = vector.broadcast %cst : f32 to vector<8x32xf32>
    %cst_1 = arith.constant 0.000000e+00 : f32
    %2 = vector.broadcast %cst_1 : f32 to vector<8x32xf32>
    %c0_i32 = arith.constant 0 : i32
    %3 = arith.index_cast %c0_i32 : i32 to index
    %c0_2 = arith.constant 0 : index
    %c0_3 = arith.constant 0 : index
    %4 = vector.load %arg0[%3, %c0_2, %c0_3] : memref<8x8x128xf32, #tpu.memory_space<vmem>>, vector<1x8x128xf32>
    %5 = vector.shape_cast %4 : vector<1x8x128xf32> to vector<8x128xf32>
    %cst_4 = arith.constant dense<0.000000e+00> : vector<8x128xf32>
    %6 = tpu.matmul %1, %0, %cst_4 {dimension_numbers = #tpu.dot_dimension_numbers<[1], [0], [0], [1], [0, 0, 1, 1], [], []>} : vector<8x32xf32>, vector<32x128xf32>, vector<8x128xf32> -> vector<8x128xf32>
    %7 = arith.addf %5, %6 : vector<8x128xf32>
    %8 = arith.negf %7 : vector<8x128xf32>
    %9 = math.exp %8 : vector<8x128xf32>
    %cst_5 = arith.constant 1.000000e+00 : f32
    %10 = vector.broadcast %cst_5 : f32 to vector<8x128xf32>
    %11 = arith.addf %10, %9 : vector<8x128xf32>
    %12 = arith.divf %10, %11 : vector<8x128xf32>
    %13 = math.tanh %7 : vector<8x128xf32>
    %14 = vector.extract_strided_slice %12 {offsets = [0, 0], sizes = [8, 32], strides = [1, 1]} : vector<8x128xf32> to vector<8x32xf32>
    %15 = vector.extract_strided_slice %12 {offsets = [0, 32], sizes = [8, 32], strides = [1, 1]} : vector<8x128xf32> to vector<8x32xf32>
    %16 = vector.extract_strided_slice %12 {offsets = [0, 96], sizes = [8, 32], strides = [1, 1]} : vector<8x128xf32> to vector<8x32xf32>
    %17 = vector.extract_strided_slice %13 {offsets = [0, 64], sizes = [8, 32], strides = [1, 1]} : vector<8x128xf32> to vector<8x32xf32>
    %18 = arith.mulf %15, %2 : vector<8x32xf32>
    %19 = arith.mulf %14, %17 : vector<8x32xf32>
    %20 = arith.addf %18, %19 : vector<8x32xf32>
    %21 = math.tanh %20 : vector<8x32xf32>
    %22 = arith.mulf %16, %21 : vector<8x32xf32>
    %23 = arith.index_cast %c0_i32 : i32 to index
    %c0_6 = arith.constant 0 : index
    %c0_7 = arith.constant 0 : index
    %24 = vector.load %arg2[%23, %c0_6, %c0_7] : memref<8x8x32xf32, #tpu.memory_space<vmem>>, vector<1x8x32xf32>
    %25 = vector.shape_cast %24 : vector<1x8x32xf32> to vector<8x32xf32>
    %26 = vector.shape_cast %22 : vector<8x32xf32> to vector<1x8x32xf32>
    tpu.vector_store %arg2[%23, %c0_6, %c0_7], %26 {strides = array<i32>} : memref<8x8x32xf32, #tpu.memory_space<vmem>>, vector<1x8x32xf32>,
    %c1_i32 = arith.constant 1 : i32
    %27 = arith.index_cast %c1_i32 : i32 to index
    %c0_8 = arith.constant 0 : index
    %c0_9 = arith.constant 0 : index
    %28 = vector.load %arg0[%27, %c0_8, %c0_9] : memref<8x8x128xf32, #tpu.memory_space<vmem>>, vector<1x8x128xf32>
    %29 = vector.shape_cast %28 : vector<1x8x128xf32> to vector<8x128xf32>
    %cst_10 = arith.constant dense<0.000000e+00> : vector<8x128xf32>
    %30 = tpu.matmul %22, %0, %cst_10 {dimension_numbers = #tpu.dot_dimension_numbers<[1], [0], [0], [1], [0, 0, 1, 1], [], []>} : vector<8x32xf32>, vector<32x128xf32>, vector<8x128xf32> -> vector<8x128xf32>
    %31 = arith.addf %29, %30 : vector<8x128xf32>
    %32 = arith.negf %31 : vector<8x128xf32>
    %33 = math.exp %32 : vector<8x128xf32>
    %cst_11 = arith.constant 1.000000e+00 : f32
    %34 = vector.broadcast %cst_11 : f32 to vector<8x128xf32>
    %35 = arith.addf %34, %33 : vector<8x128xf32>
    %36 = arith.divf %34, %35 : vector<8x128xf32>
    %37 = math.tanh %31 : vector<8x128xf32>
    %38 = vector.extract_strided_slice %36 {offsets = [0, 0], sizes = [8, 32], strides = [1, 1]} : vector<8x128xf32> to vector<8x32xf32>
    %39 = vector.extract_strided_slice %36 {offsets = [0, 32], sizes = [8, 32], strides = [1, 1]} : vector<8x128xf32> to vector<8x32xf32>
    %40 = vector.extract_strided_slice %36 {offsets = [0, 96], sizes = [8, 32], strides = [1, 1]} : vector<8x128xf32> to vector<8x32xf32>
    %41 = vector.extract_strided_slice %37 {offsets = [0, 64], sizes = [8, 32], strides = [1, 1]} : vector<8x128xf32> to vector<8x32xf32>
    %42 = arith.mulf %39, %20 : vector<8x32xf32>
    %43 = arith.mulf %38, %41 : vector<8x32xf32>
    %44 = arith.addf %42, %43 : vector<8x32xf32>
    %45 = math.tanh %44 : vector<8x32xf32>
    %46 = arith.mulf %40, %45 : vector<8x32xf32>
    %47 = arith.index_cast %c1_i32 : i32 to index
    %c0_12 = arith.constant 0 : index
    %c0_13 = arith.constant 0 : index
    %48 = vector.load %arg2[%47, %c0_12, %c0_13] : memref<8x8x32xf32, #tpu.memory_space<vmem>>, vector<1x8x32xf32>
    %49 = vector.shape_cast %48 : vector<1x8x32xf32> to vector<8x32xf32>
    %50 = vector.shape_cast %46 : vector<8x32xf32> to vector<1x8x32xf32>
    tpu.vector_store %arg2[%47, %c0_12, %c0_13], %50 {strides = array<i32>} : memref<8x8x32xf32, #tpu.memory_space<vmem>>, vector<1x8x32xf32>,
    %c2_i32 = arith.constant 2 : i32
    %51 = arith.index_cast %c2_i32 : i32 to index
    %c0_14 = arith.constant 0 : index
    %c0_15 = arith.constant 0 : index
    %52 = vector.load %arg0[%51, %c0_14, %c0_15] : memref<8x8x128xf32, #tpu.memory_space<vmem>>, vector<1x8x128xf32>
    %53 = vector.shape_cast %52 : vector<1x8x128xf32> to vector<8x128xf32>
    %cst_16 = arith.constant dense<0.000000e+00> : vector<8x128xf32>
    %54 = tpu.matmul %46, %0, %cst_16 {dimension_numbers = #tpu.dot_dimension_numbers<[1], [0], [0], [1], [0, 0, 1, 1], [], []>} : vector<8x32xf32>, vector<32x128xf32>, vector<8x128xf32> -> vector<8x128xf32>
    %55 = arith.addf %53, %54 : vector<8x128xf32>
    %56 = arith.negf %55 : vector<8x128xf32>
    %57 = math.exp %56 : vector<8x128xf32>
    %cst_17 = arith.constant 1.000000e+00 : f32
    %58 = vector.broadcast %cst_17 : f32 to vector<8x128xf32>
    %59 = arith.addf %58, %57 : vector<8x128xf32>
    %60 = arith.divf %58, %59 : vector<8x128xf32>
    %61 = math.tanh %55 : vector<8x128xf32>
    %62 = vector.extract_strided_slice %60 {offsets = [0, 0], sizes = [8, 32], strides = [1, 1]} : vector<8x128xf32> to vector<8x32xf32>
    %63 = vector.extract_strided_slice %60 {offsets = [0, 32], sizes = [8, 32], strides = [1, 1]} : vector<8x128xf32> to vector<8x32xf32>
    %64 = vector.extract_strided_slice %60 {offsets = [0, 96], sizes = [8, 32], strides = [1, 1]} : vector<8x128xf32> to vector<8x32xf32>
    %65 = vector.extract_strided_slice %61 {offsets = [0, 64], sizes = [8, 32], strides = [1, 1]} : vector<8x128xf32> to vector<8x32xf32>
    %66 = arith.mulf %63, %44 : vector<8x32xf32>
    %67 = arith.mulf %62, %65 : vector<8x32xf32>
    %68 = arith.addf %66, %67 : vector<8x32xf32>
    %69 = math.tanh %68 : vector<8x32xf32>
    %70 = arith.mulf %64, %69 : vector<8x32xf32>
    %71 = arith.index_cast %c2_i32 : i32 to index
    %c0_18 = arith.constant 0 : index
    %c0_19 = arith.constant 0 : index
    %72 = vector.load %arg2[%71, %c0_18, %c0_19] : memref<8x8x32xf32, #tpu.memory_space<vmem>>, vector<1x8x32xf32>
    %73 = vector.shape_cast %72 : vector<1x8x32xf32> to vector<8x32xf32>
    %74 = vector.shape_cast %70 : vector<8x32xf32> to vector<1x8x32xf32>
    tpu.vector_store %arg2[%71, %c0_18, %c0_19], %74 {strides = array<i32>} : memref<8x8x32xf32, #tpu.memory_space<vmem>>, vector<1x8x32xf32>,
    %c3_i32 = arith.constant 3 : i32
    %75 = arith.index_cast %c3_i32 : i32 to index
    %c0_20 = arith.constant 0 : index
    %c0_21 = arith.constant 0 : index
    %76 = vector.load %arg0[%75, %c0_20, %c0_21] : memref<8x8x128xf32, #tpu.memory_space<vmem>>, vector<1x8x128xf32>
    %77 = vector.shape_cast %76 : vector<1x8x128xf32> to vector<8x128xf32>
    %cst_22 = arith.constant dense<0.000000e+00> : vector<8x128xf32>
    %78 = tpu.matmul %70, %0, %cst_22 {dimension_numbers = #tpu.dot_dimension_numbers<[1], [0], [0], [1], [0, 0, 1, 1], [], []>} : vector<8x32xf32>, vector<32x128xf32>, vector<8x128xf32> -> vector<8x128xf32>
    %79 = arith.addf %77, %78 : vector<8x128xf32>
    %80 = arith.negf %79 : vector<8x128xf32>
    %81 = math.exp %80 : vector<8x128xf32>
    %cst_23 = arith.constant 1.000000e+00 : f32
    %82 = vector.broadcast %cst_23 : f32 to vector<8x128xf32>
    %83 = arith.addf %82, %81 : vector<8x128xf32>
    %84 = arith.divf %82, %83 : vector<8x128xf32>
    %85 = math.tanh %79 : vector<8x128xf32>
    %86 = vector.extract_strided_slice %84 {offsets = [0, 0], sizes = [8, 32], strides = [1, 1]} : vector<8x128xf32> to vector<8x32xf32>
    %87 = vector.extract_strided_slice %84 {offsets = [0, 32], sizes = [8, 32], strides = [1, 1]} : vector<8x128xf32> to vector<8x32xf32>
    %88 = vector.extract_strided_slice %84 {offsets = [0, 96], sizes = [8, 32], strides = [1, 1]} : vector<8x128xf32> to vector<8x32xf32>
    %89 = vector.extract_strided_slice %85 {offsets = [0, 64], sizes = [8, 32], strides = [1, 1]} : vector<8x128xf32> to vector<8x32xf32>
    %90 = arith.mulf %87, %68 : vector<8x32xf32>
    %91 = arith.mulf %86, %89 : vector<8x32xf32>
    %92 = arith.addf %90, %91 : vector<8x32xf32>
    %93 = math.tanh %92 : vector<8x32xf32>
    %94 = arith.mulf %88, %93 : vector<8x32xf32>
    %95 = arith.index_cast %c3_i32 : i32 to index
    %c0_24 = arith.constant 0 : index
    %c0_25 = arith.constant 0 : index
    %96 = vector.load %arg2[%95, %c0_24, %c0_25] : memref<8x8x32xf32, #tpu.memory_space<vmem>>, vector<1x8x32xf32>
    %97 = vector.shape_cast %96 : vector<1x8x32xf32> to vector<8x32xf32>
    %98 = vector.shape_cast %94 : vector<8x32xf32> to vector<1x8x32xf32>
    tpu.vector_store %arg2[%95, %c0_24, %c0_25], %98 {strides = array<i32>} : memref<8x8x32xf32, #tpu.memory_space<vmem>>, vector<1x8x32xf32>,
    %c4_i32 = arith.constant 4 : i32
    %99 = arith.index_cast %c4_i32 : i32 to index
    %c0_26 = arith.constant 0 : index
    %c0_27 = arith.constant 0 : index
    %100 = vector.load %arg0[%99, %c0_26, %c0_27] : memref<8x8x128xf32, #tpu.memory_space<vmem>>, vector<1x8x128xf32>
    %101 = vector.shape_cast %100 : vector<1x8x128xf32> to vector<8x128xf32>
    %cst_28 = arith.constant dense<0.000000e+00> : vector<8x128xf32>
    %102 = tpu.matmul %94, %0, %cst_28 {dimension_numbers = #tpu.dot_dimension_numbers<[1], [0], [0], [1], [0, 0, 1, 1], [], []>} : vector<8x32xf32>, vector<32x128xf32>, vector<8x128xf32> -> vector<8x128xf32>
    %103 = arith.addf %101, %102 : vector<8x128xf32>
    %104 = arith.negf %103 : vector<8x128xf32>
    %105 = math.exp %104 : vector<8x128xf32>
    %cst_29 = arith.constant 1.000000e+00 : f32
    %106 = vector.broadcast %cst_29 : f32 to vector<8x128xf32>
    %107 = arith.addf %106, %105 : vector<8x128xf32>
    %108 = arith.divf %106, %107 : vector<8x128xf32>
    %109 = math.tanh %103 : vector<8x128xf32>
    %110 = vector.extract_strided_slice %108 {offsets = [0, 0], sizes = [8, 32], strides = [1, 1]} : vector<8x128xf32> to vector<8x32xf32>
    %111 = vector.extract_strided_slice %108 {offsets = [0, 32], sizes = [8, 32], strides = [1, 1]} : vector<8x128xf32> to vector<8x32xf32>
    %112 = vector.extract_strided_slice %108 {offsets = [0, 96], sizes = [8, 32], strides = [1, 1]} : vector<8x128xf32> to vector<8x32xf32>
    %113 = vector.extract_strided_slice %109 {offsets = [0, 64], sizes = [8, 32], strides = [1, 1]} : vector<8x128xf32> to vector<8x32xf32>
    %114 = arith.mulf %111, %92 : vector<8x32xf32>
    %115 = arith.mulf %110, %113 : vector<8x32xf32>
    %116 = arith.addf %114, %115 : vector<8x32xf32>
    %117 = math.tanh %116 : vector<8x32xf32>
    %118 = arith.mulf %112, %117 : vector<8x32xf32>
    %119 = arith.index_cast %c4_i32 : i32 to index
    %c0_30 = arith.constant 0 : index
    %c0_31 = arith.constant 0 : index
    %120 = vector.load %arg2[%119, %c0_30, %c0_31] : memref<8x8x32xf32, #tpu.memory_space<vmem>>, vector<1x8x32xf32>
    %121 = vector.shape_cast %120 : vector<1x8x32xf32> to vector<8x32xf32>
    %122 = vector.shape_cast %118 : vector<8x32xf32> to vector<1x8x32xf32>
    tpu.vector_store %arg2[%119, %c0_30, %c0_31], %122 {strides = array<i32>} : memref<8x8x32xf32, #tpu.memory_space<vmem>>, vector<1x8x32xf32>,
    %c5_i32 = arith.constant 5 : i32
    %123 = arith.index_cast %c5_i32 : i32 to index
    %c0_32 = arith.constant 0 : index
    %c0_33 = arith.constant 0 : index
    %124 = vector.load %arg0[%123, %c0_32, %c0_33] : memref<8x8x128xf32, #tpu.memory_space<vmem>>, vector<1x8x128xf32>
    %125 = vector.shape_cast %124 : vector<1x8x128xf32> to vector<8x128xf32>
    %cst_34 = arith.constant dense<0.000000e+00> : vector<8x128xf32>
    %126 = tpu.matmul %118, %0, %cst_34 {dimension_numbers = #tpu.dot_dimension_numbers<[1], [0], [0], [1], [0, 0, 1, 1], [], []>} : vector<8x32xf32>, vector<32x128xf32>, vector<8x128xf32> -> vector<8x128xf32>
    %127 = arith.addf %125, %126 : vector<8x128xf32>
    %128 = arith.negf %127 : vector<8x128xf32>
    %129 = math.exp %128 : vector<8x128xf32>
    %cst_35 = arith.constant 1.000000e+00 : f32
    %130 = vector.broadcast %cst_35 : f32 to vector<8x128xf32>
    %131 = arith.addf %130, %129 : vector<8x128xf32>
    %132 = arith.divf %130, %131 : vector<8x128xf32>
    %133 = math.tanh %127 : vector<8x128xf32>
    %134 = vector.extract_strided_slice %132 {offsets = [0, 0], sizes = [8, 32], strides = [1, 1]} : vector<8x128xf32> to vector<8x32xf32>
    %135 = vector.extract_strided_slice %132 {offsets = [0, 32], sizes = [8, 32], strides = [1, 1]} : vector<8x128xf32> to vector<8x32xf32>
    %136 = vector.extract_strided_slice %132 {offsets = [0, 96], sizes = [8, 32], strides = [1, 1]} : vector<8x128xf32> to vector<8x32xf32>
    %137 = vector.extract_strided_slice %133 {offsets = [0, 64], sizes = [8, 32], strides = [1, 1]} : vector<8x128xf32> to vector<8x32xf32>
    %138 = arith.mulf %135, %116 : vector<8x32xf32>
    %139 = arith.mulf %134, %137 : vector<8x32xf32>
    %140 = arith.addf %138, %139 : vector<8x32xf32>
    %141 = math.tanh %140 : vector<8x32xf32>
    %142 = arith.mulf %136, %141 : vector<8x32xf32>
    %143 = arith.index_cast %c5_i32 : i32 to index
    %c0_36 = arith.constant 0 : index
    %c0_37 = arith.constant 0 : index
    %144 = vector.load %arg2[%143, %c0_36, %c0_37] : memref<8x8x32xf32, #tpu.memory_space<vmem>>, vector<1x8x32xf32>
    %145 = vector.shape_cast %144 : vector<1x8x32xf32> to vector<8x32xf32>
    %146 = vector.shape_cast %142 : vector<8x32xf32> to vector<1x8x32xf32>
    tpu.vector_store %arg2[%143, %c0_36, %c0_37], %146 {strides = array<i32>} : memref<8x8x32xf32, #tpu.memory_space<vmem>>, vector<1x8x32xf32>,
    %c6_i32 = arith.constant 6 : i32
    %147 = arith.index_cast %c6_i32 : i32 to index
    %c0_38 = arith.constant 0 : index
    %c0_39 = arith.constant 0 : index
    %148 = vector.load %arg0[%147, %c0_38, %c0_39] : memref<8x8x128xf32, #tpu.memory_space<vmem>>, vector<1x8x128xf32>
    %149 = vector.shape_cast %148 : vector<1x8x128xf32> to vector<8x128xf32>
    %cst_40 = arith.constant dense<0.000000e+00> : vector<8x128xf32>
    %150 = tpu.matmul %142, %0, %cst_40 {dimension_numbers = #tpu.dot_dimension_numbers<[1], [0], [0], [1], [0, 0, 1, 1], [], []>} : vector<8x32xf32>, vector<32x128xf32>, vector<8x128xf32> -> vector<8x128xf32>
    %151 = arith.addf %149, %150 : vector<8x128xf32>
    %152 = arith.negf %151 : vector<8x128xf32>
    %153 = math.exp %152 : vector<8x128xf32>
    %cst_41 = arith.constant 1.000000e+00 : f32
    %154 = vector.broadcast %cst_41 : f32 to vector<8x128xf32>
    %155 = arith.addf %154, %153 : vector<8x128xf32>
    %156 = arith.divf %154, %155 : vector<8x128xf32>
    %157 = math.tanh %151 : vector<8x128xf32>
    %158 = vector.extract_strided_slice %156 {offsets = [0, 0], sizes = [8, 32], strides = [1, 1]} : vector<8x128xf32> to vector<8x32xf32>
    %159 = vector.extract_strided_slice %156 {offsets = [0, 32], sizes = [8, 32], strides = [1, 1]} : vector<8x128xf32> to vector<8x32xf32>
    %160 = vector.extract_strided_slice %156 {offsets = [0, 96], sizes = [8, 32], strides = [1, 1]} : vector<8x128xf32> to vector<8x32xf32>
    %161 = vector.extract_strided_slice %157 {offsets = [0, 64], sizes = [8, 32], strides = [1, 1]} : vector<8x128xf32> to vector<8x32xf32>
    %162 = arith.mulf %159, %140 : vector<8x32xf32>
    %163 = arith.mulf %158, %161 : vector<8x32xf32>
    %164 = arith.addf %162, %163 : vector<8x32xf32>
    %165 = math.tanh %164 : vector<8x32xf32>
    %166 = arith.mulf %160, %165 : vector<8x32xf32>
    %167 = arith.index_cast %c6_i32 : i32 to index
    %c0_42 = arith.constant 0 : index
    %c0_43 = arith.constant 0 : index
    %168 = vector.load %arg2[%167, %c0_42, %c0_43] : memref<8x8x32xf32, #tpu.memory_space<vmem>>, vector<1x8x32xf32>
    %169 = vector.shape_cast %168 : vector<1x8x32xf32> to vector<8x32xf32>
    %170 = vector.shape_cast %166 : vector<8x32xf32> to vector<1x8x32xf32>
    tpu.vector_store %arg2[%167, %c0_42, %c0_43], %170 {strides = array<i32>} : memref<8x8x32xf32, #tpu.memory_space<vmem>>, vector<1x8x32xf32>,
    %c7_i32 = arith.constant 7 : i32
    %171 = arith.index_cast %c7_i32 : i32 to index
    %c0_44 = arith.constant 0 : index
    %c0_45 = arith.constant 0 : index
    %172 = vector.load %arg0[%171, %c0_44, %c0_45] : memref<8x8x128xf32, #tpu.memory_space<vmem>>, vector<1x8x128xf32>
    %173 = vector.shape_cast %172 : vector<1x8x128xf32> to vector<8x128xf32>
    %cst_46 = arith.constant dense<0.000000e+00> : vector<8x128xf32>
    %174 = tpu.matmul %166, %0, %cst_46 {dimension_numbers = #tpu.dot_dimension_numbers<[1], [0], [0], [1], [0, 0, 1, 1], [], []>} : vector<8x32xf32>, vector<32x128xf32>, vector<8x128xf32> -> vector<8x128xf32>
    %175 = arith.addf %173, %174 : vector<8x128xf32>
    %176 = arith.negf %175 : vector<8x128xf32>
    %177 = math.exp %176 : vector<8x128xf32>
    %cst_47 = arith.constant 1.000000e+00 : f32
    %178 = vector.broadcast %cst_47 : f32 to vector<8x128xf32>
    %179 = arith.addf %178, %177 : vector<8x128xf32>
    %180 = arith.divf %178, %179 : vector<8x128xf32>
    %181 = math.tanh %175 : vector<8x128xf32>
    %182 = vector.extract_strided_slice %180 {offsets = [0, 0], sizes = [8, 32], strides = [1, 1]} : vector<8x128xf32> to vector<8x32xf32>
    %183 = vector.extract_strided_slice %180 {offsets = [0, 32], sizes = [8, 32], strides = [1, 1]} : vector<8x128xf32> to vector<8x32xf32>
    %184 = vector.extract_strided_slice %180 {offsets = [0, 96], sizes = [8, 32], strides = [1, 1]} : vector<8x128xf32> to vector<8x32xf32>
    %185 = vector.extract_strided_slice %181 {offsets = [0, 64], sizes = [8, 32], strides = [1, 1]} : vector<8x128xf32> to vector<8x32xf32>
    %186 = arith.mulf %183, %164 : vector<8x32xf32>
    %187 = arith.mulf %182, %185 : vector<8x32xf32>
    %188 = arith.addf %186, %187 : vector<8x32xf32>
    %189 = math.tanh %188 : vector<8x32xf32>
    %190 = arith.mulf %184, %189 : vector<8x32xf32>
    %191 = arith.index_cast %c7_i32 : i32 to index
    %c0_48 = arith.constant 0 : index
    %c0_49 = arith.constant 0 : index
    %192 = vector.load %arg2[%191, %c0_48, %c0_49] : memref<8x8x32xf32, #tpu.memory_space<vmem>>, vector<1x8x32xf32>
    %193 = vector.shape_cast %192 : vector<1x8x32xf32> to vector<8x32xf32>
    %194 = vector.shape_cast %190 : vector<8x32xf32> to vector<1x8x32xf32>
    tpu.vector_store %arg2[%191, %c0_48, %c0_49], %194 {strides = array<i32>} : memref<8x8x32xf32, #tpu.memory_space<vmem>>, vector<1x8x32xf32>,
    %c8_i32 = arith.constant 8 : i32
    return
  }
}

</mosaic_0001>

<bundles_post_ra>
// kernel: flow_lstm_forward.1
= control target key start
LH: loop header
LB: loop body
LE: loop exit
PB: predicated region body
PF: predicated region fallthrough
CT: control target
= control target key end

     0   :  { %v1133_v0 = vmov 0.0|0.0   ;;  %vm1134_vm0 = vmmov 0   ;;  %v1135_v4 = vmov 0.0   ;;  %s1136_s18 = smov 64   ;;  %s1137_s19 = smov 32   ;;  %vm16_vm1 = vcmask 261120   ;;  %s1313_s1 = inlined_call_operand.vmem [shape: f32[32,128], index: 1, kind: input, shape index: {}]   ;;  %s1314_s0 = inlined_call_operand.vmem [shape: f32[8,8,128], index: 0, kind: input, shape index: {}]   ;;  %s1315_s2 = inlined_call_operand.vmem [shape: f32[8,8,32], index: 2, kind: output, shape index: {}]  }
   0x1   :  { %1016 = vmatprep.subr.bf16.mxu0 %v1133_v0  ;;  %v11_v1 = vld [vmem:[%s1313_s1] sm:$0xff]  ;;  %v12_v2 = vld [vmem:[%s1313_s1 + $0x8] sm:$0xff]  ;;  %v13_v3 = vld [vmem:[%s1313_s1 + $0x10] sm:$0xff]  ;;  %936 = vmatprep.mubr.msk.f32.mxu0 %vm1134_vm0, %v1135_v4 }
   0x2   :  { %v1165_v5 = vpack.c.bf16 %v12_v2, %v11_v1  ;;  %v14_v6 = vld [vmem:[%s1313_s1 + $0x18] sm:$0xff]  ;;  %1022 = vmatprep.subr.bf16.mxu1 %v1133_v0  ;;  %947 = vmatprep.mubr.msk.f32.mxu1 %vm1134_vm0, %v1135_v4  ;;  %v15_v8 = vld [vmem:[%s1314_s0] sm:$0xff]  ;;  %v860_v26 = vld [vmem:[%s1314_s0 + $0x8] sm:$0xff] }
   0x3   :  { %v1174_v7 = vpack.c.bf16 %v14_v6, %v13_v3  ;;  %v864_v44 = vld [vmem:[%s1314_s0 + $0x10] sm:$0xff]  ;;  %v868_v62 = vld [vmem:[%s1314_s0 + $0x18] sm:$0xff] }
   0x4   :  { %1018 = vmatpush3.bf16.msra.mxu0 %v1165_v5  ;;  %1024 = vmatpush3.bf16.msra.mxu1 %v1165_v5 }
   0x5   :  { %1019 = vmatprep.subr.bf16.mxu0 %v1133_v0  ;;  %1025 = vmatprep.subr.bf16.mxu1 %v1133_v0 }
   0x8   :  { %1021 = vmatpush3.bf16.msra.mxu0 %v1174_v7  ;;  %1027 = vmatpush3.bf16.msra.mxu1 %v1174_v7 }
   0x9   :  { %1028 = vmatprep.subr.bf16.mxu0 %v1133_v0  ;;  %1034 = vmatprep.subr.bf16.mxu1 %v1133_v0 }
   0xb   :  { %937 = vmatmul.mubr.f32.vlgmr.msra.gmra.mrb[0].mxu0 %v1135_v4 }
   0xc   :  { %1030 = vmatpush3.bf16.msra.mxu0 %v1165_v5  ;;  %958 = vmatprep.mubr.msk.f32.mxu0 %vm1134_vm0, %v1135_v4 }
   0xd   :  { %1031 = vmatprep.subr.bf16.mxu0 %v1133_v0 }
  0x10   :  { %1033 = vmatpush3.bf16.msra.mxu0 %v1174_v7 }
  0x11   :  { %1040 = vmatprep.subr.bf16.mxu0 %v1133_v0 }
  0xde   :  { %v86_v9 = vpop.f32.mrb[0].mxu0 }
  0xdf   :  { %v90_v10 = vadd.f32 %v86_v9, %v15_v8  ;;  %v938_v11 = vpop.f32.mrb[1].mxu0 }
  0xe1   :  { %1069 = vtanh.f32 %v90_v10  ;;  %v859_v13 = vmul.f32 -1.442695, %v90_v10 }
  0xe3   :  { %1071 = vpow2.f32 %v859_v13 }
  0xeb   :  { %v1070_v12 = vpop.eup %1069 }
  0xec   :  { %100 = vrot.lane.b32.xlu0 %v1070_v12, %s1136_s18 }
  0xed   :  { %v1072_v14 = vpop.eup %1071 }
  0xee   :  { %v94_v15 = vadd.f32 1.0, %v1072_v14 }
  0xf0   :  { %1073 = vrcp.f32 %v94_v15 }
  0xfa   :  { %v1074_v16 = vpop.eup %1073 }
  0xfb   :  { %v98_v19 = vmul.f32 0.0, %v1074_v16 }
 0x15e   :  { %v101_v17 = vpop.permute.xlu0 %100 }
 0x15f   :  { %v103_v18 = vmul.f32 %v1074_v16, %v101_v17 }
 0x161   :  { %105 = vrot.lane.b32.xlu0 %v103_v18, %s1137_s19 }
 0x1d3   :  { %v106_v20 = vpop.permute.xlu0 %105 }
 0x1d4   :  { %v108_v21 = vadd.f32 %v106_v20, %v98_v19  ;;  %v872_v20 = vld [vmem:[%s1314_s0 + $0x20] sm:$0xff] }
 0x1d6   :  { %1075 = vtanh.f32 %v108_v21 }
 0x1e0   :  { %v1076_v22 = vpop.eup %1075 }
 0x1e1   :  { %111 = vrot.lane.b32.xlu1 %v1076_v22, %s1136_s18 }
 0x253   :  { %v112_v23 = vpop.permute.xlu1 %111 }
 0x254   :  { %v114_v24 = vmul.f32 %v1074_v16, %v112_v23 }
 0x256   :  { %116 = vrot.lane.b32.xlu1 %v114_v24, %s1137_s19 }
 0x2c8   :  { %v117_v25 = vpop.permute.xlu1 %116 }
 0x2c9   :  { %119 = vst.msk [vmem:[%s1315_s2] sm:$0xff] %vm16_vm1, %v117_v25  ;;  %948 = vmatmul.mubr.msk.f32.vlgmr.msra.gmra.mrb[0].mxu1 %vm16_vm1, %v117_v25 }
 0x2ca   :  { %1036 = vmatpush3.bf16.msra.mxu1 %v1165_v5  ;;  %969 = vmatprep.mubr.msk.f32.mxu1 %vm1134_vm0, %v1135_v4 }
 0x2cb   :  { %1037 = vmatprep.subr.bf16.mxu1 %v1133_v0 }
 0x2ce   :  { %1039 = vmatpush3.bf16.msra.mxu1 %v1174_v7 }
 0x2cf   :  { %1046 = vmatprep.subr.bf16.mxu1 %v1133_v0 }
 0x39c   :  { %v190_v27 = vpop.f32.mrb[0].mxu1 }
 0x39d   :  { %v194_v28 = vadd.f32 %v860_v26, %v190_v27  ;;  %v949_v29 = vpop.f32.mrb[1].mxu1 }
 0x39f   :  { %1077 = vtanh.f32 %v194_v28  ;;  %v862_v31 = vmul.f32 -1.442695, %v194_v28 }
 0x3a1   :  { %1079 = vpow2.f32 %v862_v31 }
 0x3a9   :  { %v1078_v30 = vpop.eup %1077 }
 0x3aa   :  { %204 = vrot.lane.b32.xlu0 %v1078_v30, %s1136_s18 }
 0x3ab   :  { %v1080_v32 = vpop.eup %1079 }
 0x3ac   :  { %v198_v33 = vadd.f32 1.0, %v1080_v32 }
 0x3ae   :  { %1081 = vrcp.f32 %v198_v33 }
 0x3b8   :  { %v1082_v34 = vpop.eup %1081 }
 0x3b9   :  { %v202_v37 = vmul.f32 %v1082_v34, %v108_v21 }
 0x41c   :  { %v205_v35 = vpop.permute.xlu0 %204 }
 0x41d   :  { %v207_v36 = vmul.f32 %v1082_v34, %v205_v35 }
 0x41f   :  { %209 = vrot.lane.b32.xlu1 %v207_v36, %s1137_s19 }
 0x491   :  { %v210_v38 = vpop.permute.xlu1 %209 }
 0x492   :  { %v212_v39 = vadd.f32 %v210_v38, %v202_v37  ;;  %v876_v38 = vld [vmem:[%s1314_s0 + $0x28] sm:$0xff] }
 0x494   :  { %1083 = vtanh.f32 %v212_v39 }
 0x49e   :  { %v1084_v40 = vpop.eup %1083 }
 0x49f   :  { %215 = vrot.lane.b32.xlu0 %v1084_v40, %s1136_s18 }
 0x511   :  { %v216_v41 = vpop.permute.xlu0 %215 }
 0x512   :  { %v218_v42 = vmul.f32 %v1082_v34, %v216_v41 }
 0x514   :  { %220 = vrot.lane.b32.xlu1 %v218_v42, %s1137_s19 }
 0x586   :  { %v221_v43 = vpop.permute.xlu1 %220 }
 0x587   :  { %863 = vst.msk [vmem:[%s1315_s2 + $0x8] sm:$0xff] %vm16_vm1, %v221_v43  ;;  %959 = vmatmul.mubr.msk.f32.vlgmr.msra.gmra.mrb[2].mxu0 %vm16_vm1, %v221_v43 }
 0x588   :  { %1042 = vmatpush3.bf16.msra.mxu0 %v1165_v5  ;;  %980 = vmatprep.mubr.msk.f32.mxu0 %vm1134_vm0, %v1135_v4 }
 0x589   :  { %1043 = vmatprep.subr.bf16.mxu0 %v1133_v0 }
 0x58c   :  { %1045 = vmatpush3.bf16.msra.mxu0 %v1174_v7 }
 0x58d   :  { %1052 = vmatprep.subr.bf16.mxu0 %v1133_v0 }
 0x65a   :  { %v295_v45 = vpop.f32.mrb[2].mxu0 }
 0x65b   :  { %v299_v46 = vadd.f32 %v864_v44, %v295_v45  ;;  %v960_v47 = vpop.f32.mrb[3].mxu0 }
 0x65d   :  { %1085 = vtanh.f32 %v299_v46  ;;  %v866_v49 = vmul.f32 -1.442695, %v299_v46 }
 0x65f   :  { %1087 = vpow2.f32 %v866_v49 }
 0x667   :  { %v1086_v48 = vpop.eup %1085 }
 0x668   :  { %309 = vrot.lane.b32.xlu0 %v1086_v48, %s1136_s18 }
 0x669   :  { %v1088_v50 = vpop.eup %1087 }
 0x66a   :  { %v303_v51 = vadd.f32 1.0, %v1088_v50 }
 0x66c   :  { %1089 = vrcp.f32 %v303_v51 }
 0x676   :  { %v1090_v52 = vpop.eup %1089 }
 0x677   :  { %v307_v55 = vmul.f32 %v1090_v52, %v212_v39 }
 0x6da   :  { %v310_v53 = vpop.permute.xlu0 %309 }
 0x6db   :  { %v312_v54 = vmul.f32 %v1090_v52, %v310_v53 }
 0x6dd   :  { %314 = vrot.lane.b32.xlu1 %v312_v54, %s1137_s19 }
 0x74f   :  { %v315_v56 = vpop.permute.xlu1 %314 }
 0x750   :  { %v317_v57 = vadd.f32 %v315_v56, %v307_v55 }
 0x752   :  { %1091 = vtanh.f32 %v317_v57 }
 0x75c   :  { %v1092_v58 = vpop.eup %1091 }
 0x75d   :  { %320 = vrot.lane.b32.xlu0 %v1092_v58, %s1136_s18 }
 0x7cf   :  { %v321_v59 = vpop.permute.xlu0 %320 }
 0x7d0   :  { %v323_v60 = vmul.f32 %v1090_v52, %v321_v59  ;;  %v880_v52 = vld [vmem:[%s1314_s0 + $0x30] sm:$0xff] }
 0x7d2   :  { %325 = vrot.lane.b32.xlu1 %v323_v60, %s1137_s19 }
 0x844   :  { %v326_v61 = vpop.permute.xlu1 %325 }
 0x845   :  { %867 = vst.msk [vmem:[%s1315_s2 + $0x10] sm:$0xff] %vm16_vm1, %v326_v61  ;;  %970 = vmatmul.mubr.msk.f32.vlgmr.msra.gmra.mrb[2].mxu1 %vm16_vm1, %v326_v61 }
 0x846   :  { %1048 = vmatpush3.bf16.msra.mxu1 %v1165_v5  ;;  %991 = vmatprep.mubr.msk.f32.mxu1 %vm1134_vm0, %v1135_v4 }
 0x847   :  { %1049 = vmatprep.subr.bf16.mxu1 %v1133_v0 }
 0x84a   :  { %1051 = vmatpush3.bf16.msra.mxu1 %v1174_v7 }
 0x84b   :  { %1058 = vmatprep.subr.bf16.mxu1 %v1133_v0 }
 0x918   :  { %v400_v63 = vpop.f32.mrb[2].mxu1 }
 0x919   :  { %v404_v1 = vadd.f32 %v868_v62, %v400_v63  ;;  %v971_v2 = vpop.f32.mrb[3].mxu1 }
 0x91b   :  { %1093 = vtanh.f32 %v404_v1  ;;  %v870_v6 = vmul.f32 -1.442695, %v404_v1 }
 0x91d   :  { %1095 = vpow2.f32 %v870_v6 }
 0x925   :  { %v1094_v3 = vpop.eup %1093 }
 0x926   :  { %414 = vrot.lane.b32.xlu0 %v1094_v3, %s1136_s18 }
 0x927   :  { %v1096_v8 = vpop.eup %1095 }
 0x928   :  { %v408_v9 = vadd.f32 1.0, %v1096_v8 }
 0x92a   :  { %1097 = vrcp.f32 %v408_v9 }
 0x934   :  { %v1098_v10 = vpop.eup %1097 }
 0x935   :  { %v412_v13 = vmul.f32 %v1098_v10, %v317_v57 }
 0x998   :  { %v415_v11 = vpop.permute.xlu0 %414 }
 0x999   :  { %v417_v12 = vmul.f32 %v1098_v10, %v415_v11 }
 0x99b   :  { %419 = vrot.lane.b32.xlu1 %v417_v12, %s1137_s19 }
 0xa0d   :  { %v420_v14 = vpop.permute.xlu1 %419 }
 0xa0e   :  { %v422_v15 = vadd.f32 %v420_v14, %v412_v13 }
 0xa10   :  { %1099 = vtanh.f32 %v422_v15 }
 0xa1a   :  { %v1100_v16 = vpop.eup %1099 }
 0xa1b   :  { %425 = vrot.lane.b32.xlu0 %v1100_v16, %s1136_s18 }
 0xa8d   :  { %v426_v17 = vpop.permute.xlu0 %425 }
 0xa8e   :  { %v428_v18 = vmul.f32 %v1098_v10, %v426_v17  ;;  %v884_v10 = vld [vmem:[%s1314_s0 + $0x38] sm:$0xff] }
 0xa90   :  { %430 = vrot.lane.b32.xlu1 %v428_v18, %s1137_s19 }
 0xb02   :  { %v431_v19 = vpop.permute.xlu1 %430 }
 0xb03   :  { %871 = vst.msk [vmem:[%s1315_s2 + $0x18] sm:$0xff] %vm16_vm1, %v431_v19  ;;  %981 = vmatmul.mubr.msk.f32.vlgmr.msra.gmra.mrb[4].mxu0 %vm16_vm1, %v431_v19 }
 0xb04   :  { %1054 = vmatpush3.bf16.msra.mxu0 %v1165_v5  ;;  %1002 = vmatprep.mubr.msk.f32.mxu0 %vm1134_vm0, %v1135_v4 }
 0xb05   :  { %1055 = vmatprep.subr.bf16.mxu0 %v1133_v0 }
 0xb08   :  { %1057 = vmatpush3.bf16.msra.mxu0 %v1174_v7 }
 0xbd6   :  { %v505_v21 = vpop.f32.mrb[4].mxu0 }
 0xbd7   :  { %v509_v22 = vadd.f32 %v872_v20, %v505_v21  ;;  %v982_v23 = vpop.f32.mrb[5].mxu0 }
 0xbd9   :  { %1101 = vtanh.f32 %v509_v22  ;;  %v874_v25 = vmul.f32 -1.442695, %v509_v22 }
 0xbdb   :  { %1103 = vpow2.f32 %v874_v25 }
 0xbe3   :  { %v1102_v24 = vpop.eup %1101 }
 0xbe4   :  { %519 = vrot.lane.b32.xlu0 %v1102_v24, %s1136_s18 }
 0xbe5   :  { %v1104_v26 = vpop.eup %1103 }
 0xbe6   :  { %v513_v27 = vadd.f32 1.0, %v1104_v26 }
 0xbe8   :  { %1105 = vrcp.f32 %v513_v27 }
 0xbf2   :  { %v1106_v28 = vpop.eup %1105 }
 0xbf3   :  { %v517_v31 = vmul.f32 %v1106_v28, %v422_v15 }
 0xc56   :  { %v520_v29 = vpop.permute.xlu0 %519 }
 0xc57   :  { %v522_v30 = vmul.f32 %v1106_v28, %v520_v29 }
 0xc59   :  { %524 = vrot.lane.b32.xlu1 %v522_v30, %s1137_s19 }
 0xccb   :  { %v525_v32 = vpop.permute.xlu1 %524 }
 0xccc   :  { %v527_v33 = vadd.f32 %v525_v32, %v517_v31 }
 0xcce   :  { %1107 = vtanh.f32 %v527_v33 }
 0xcd8   :  { %v1108_v34 = vpop.eup %1107 }
 0xcd9   :  { %530 = vrot.lane.b32.xlu0 %v1108_v34, %s1136_s18 }
 0xd4b   :  { %v531_v35 = vpop.permute.xlu0 %530 }
 0xd4c   :  { %v533_v36 = vmul.f32 %v1106_v28, %v531_v35 }
 0xd4e   :  { %535 = vrot.lane.b32.xlu1 %v533_v36, %s1137_s19 }
 0xdc0   :  { %v536_v37 = vpop.permute.xlu1 %535 }
 0xdc1   :  { %875 = vst.msk [vmem:[%s1315_s2 + $0x20] sm:$0xff] %vm16_vm1, %v536_v37  ;;  %992 = vmatmul.mubr.msk.f32.vlgmr.msra.gmra.mrb[4].mxu1 %vm16_vm1, %v536_v37 }
 0xdc2   :  { %1060 = vmatpush3.bf16.msra.mxu1 %v1165_v5  ;;  %1013 = vmatprep.mubr.msk.f32.mxu1 %vm1134_vm0, %v1135_v4 }
 0xdc3   :  { %1061 = vmatprep.subr.bf16.mxu1 %v1133_v0 }
 0xdc6   :  { %1063 = vmatpush3.bf16.msra.mxu1 %v1174_v7 }
 0xe94   :  { %v610_v39 = vpop.f32.mrb[4].mxu1 }
 0xe95   :  { %v614_v40 = vadd.f32 %v876_v38, %v610_v39  ;;  %v993_v41 = vpop.f32.mrb[5].mxu1 }
 0xe97   :  { %1109 = vtanh.f32 %v614_v40  ;;  %v878_v43 = vmul.f32 -1.442695, %v614_v40 }
 0xe99   :  { %1111 = vpow2.f32 %v878_v43 }
 0xea1   :  { %v1110_v42 = vpop.eup %1109 }
 0xea2   :  { %624 = vrot.lane.b32.xlu0 %v1110_v42, %s1136_s18 }
 0xea3   :  { %v1112_v5 = vpop.eup %1111 }
 0xea4   :  { %v618_v44 = vadd.f32 1.0, %v1112_v5 }
 0xea6   :  { %1113 = vrcp.f32 %v618_v44 }
 0xeb0   :  { %v1114_v4 = vpop.eup %1113 }
 0xeb1   :  { %v622_v7 = vmul.f32 %v1114_v4, %v527_v33 }
 0xf14   :  { %v625_v0 = vpop.permute.xlu0 %624 }
 0xf15   :  { %v627_v45 = vmul.f32 %v1114_v4, %v625_v0 }
 0xf17   :  { %629 = vrot.lane.b32.xlu1 %v627_v45, %s1137_s19 }
 0xf89   :  { %v630_v46 = vpop.permute.xlu1 %629 }
 0xf8a   :  { %v632_v47 = vadd.f32 %v630_v46, %v622_v7 }
 0xf8c   :  { %1115 = vtanh.f32 %v632_v47 }
 0xf96   :  { %v1116_v48 = vpop.eup %1115 }
 0xf97   :  { %635 = vrot.lane.b32.xlu0 %v1116_v48, %s1136_s18 }
0x1009   :  { %v636_v49 = vpop.permute.xlu0 %635 }
0x100a   :  { %v638_v50 = vmul.f32 %v1114_v4, %v636_v49 }
0x100c   :  { %640 = vrot.lane.b32.xlu1 %v638_v50, %s1137_s19 }
0x107e   :  { %v641_v51 = vpop.permute.xlu1 %640 }
0x107f   :  { %879 = vst.msk [vmem:[%s1315_s2 + $0x28] sm:$0xff] %vm16_vm1, %v641_v51  ;;  %1003 = vmatmul.mubr.msk.f32.vlgmr.msra.gmra.mrb[6].mxu0 %vm16_vm1, %v641_v51 }
0x1152   :  { %v715_v53 = vpop.f32.mrb[6].mxu0 }
0x1153   :  { %v719_v54 = vadd.f32 %v880_v52, %v715_v53  ;;  %v1004_v55 = vpop.f32.mrb[7].mxu0 }
0x1155   :  { %1117 = vtanh.f32 %v719_v54  ;;  %v882_v57 = vmul.f32 -1.442695, %v719_v54 }
0x1157   :  { %1119 = vpow2.f32 %v882_v57 }
0x115f   :  { %v1118_v56 = vpop.eup %1117 }
0x1160   :  { %729 = vrot.lane.b32.xlu0 %v1118_v56, %s1136_s18 }
0x1161   :  { %v1120_v58 = vpop.eup %1119 }
0x1162   :  { %v723_v59 = vadd.f32 1.0, %v1120_v58 }
0x1164   :  { %1121 = vrcp.f32 %v723_v59 }
0x116e   :  { %v1122_v60 = vpop.eup %1121 }
0x116f   :  { %v727_v63 = vmul.f32 %v1122_v60, %v632_v47 }
0x11d2   :  { %v730_v61 = vpop.permute.xlu0 %729 }
0x11d3   :  { %v732_v62 = vmul.f32 %v1122_v60, %v730_v61 }
0x11d5   :  { %734 = vrot.lane.b32.xlu1 %v732_v62, %s1137_s19 }
0x1247   :  { %v735_v1 = vpop.permute.xlu1 %734 }
0x1248   :  { %v737_v2 = vadd.f32 %v735_v1, %v727_v63 }
0x124a   :  { %1123 = vtanh.f32 %v737_v2 }
0x1254   :  { %v1124_v3 = vpop.eup %1123 }
0x1255   :  { %740 = vrot.lane.b32.xlu0 %v1124_v3, %s1136_s18 }
0x12c7   :  { %v741_v6 = vpop.permute.xlu0 %740 }
0x12c8   :  { %v743_v8 = vmul.f32 %v1122_v60, %v741_v6 }
0x12ca   :  { %745 = vrot.lane.b32.xlu1 %v743_v8, %s1137_s19 }
0x133c   :  { %v746_v9 = vpop.permute.xlu1 %745 }
0x133d   :  { %883 = vst.msk [vmem:[%s1315_s2 + $0x30] sm:$0xff] %vm16_vm1, %v746_v9  ;;  %1014 = vmatmul.mubr.msk.f32.vlgmr.msra.gmra.mrb[6].mxu1 %vm16_vm1, %v746_v9 }
0x1410   :  { %v820_v11 = vpop.f32.mrb[6].mxu1 }
0x1411   :  { %v824_v12 = vadd.f32 %v884_v10, %v820_v11  ;;  %v1015_v13 = vpop.f32.mrb[7].mxu1 }
0x1413   :  { %1125 = vtanh.f32 %v824_v12  ;;  %v886_v15 = vmul.f32 -1.442695, %v824_v12 }
0x1415   :  { %1127 = vpow2.f32 %v886_v15 }
0x141d   :  { %v1126_v14 = vpop.eup %1125 }
0x141e   :  { %834 = vrot.lane.b32.xlu0 %v1126_v14, %s1136_s18 }
0x141f   :  { %v1128_v16 = vpop.eup %1127 }
0x1420   :  { %v828_v17 = vadd.f32 1.0, %v1128_v16 }
0x1422   :  { %1129 = vrcp.f32 %v828_v17 }
0x142c   :  { %v1130_v18 = vpop.eup %1129 }
0x142d   :  { %v832_v21 = vmul.f32 %v1130_v18, %v737_v2 }
0x1490   :  { %v835_v19 = vpop.permute.xlu0 %834 }
0x1491   :  { %v837_v20 = vmul.f32 %v1130_v18, %v835_v19 }
0x1493   :  { %839 = vrot.lane.b32.xlu1 %v837_v20, %s1137_s19 }
0x1505   :  { %v840_v22 = vpop.permute.xlu1 %839 }
0x1506   :  { %v842_v23 = vadd.f32 %v840_v22, %v832_v21 }
0x1508   :  { %1131 = vtanh.f32 %v842_v23 }
0x1512   :  { %v1132_v24 = vpop.eup %1131 }
0x1513   :  { %845 = vrot.lane.b32.xlu0 %v1132_v24, %s1136_s18 }
0x1585   :  { %v846_v25 = vpop.permute.xlu0 %845 }
0x1586   :  { %v848_v26 = vmul.f32 %v1130_v18, %v846_v25 }
0x1588   :  { %850 = vrot.lane.b32.xlu1 %v848_v26, %s1137_s19 }
0x15fa   :  { %v851_v27 = vpop.permute.xlu1 %850 }
0x15fb   :  { %887 = vst.msk [vmem:[%s1315_s2 + $0x38] sm:$0xff] %vm16_vm1, %v851_v27 }

</bundles_post_ra>
